<compile_context>
chip_gen: v5e
topology: v5e:2x2
jax: 0.10.0
libtpu: 0.0.40
codegen_flags: <defaults>
</compile_context>

<pallas_src>
import math
from functools import partial

import jax
import jax.numpy as jnp
from jax.experimental import pallas as pl
from jax.experimental.pallas import tpu as pltpu

CLASSES = 43
SMOOTHING = 0.01


def _label_smoothing_kernel(pred_ref, label_ref, out_ref, *, classes, base,
                            conf_minus_base, ent_const, tb, b_real, masked):
    # pred_ref: (C, TB) block of transposed logits; label_ref: (1, TB) int32.
    x = pred_ref[...].astype(jnp.float32)                       # (C, TB)
    labels = label_ref[...]                                     # (1, TB)

    # Fused log-softmax pieces over the class (sublane) axis; logp never materialised.
    m = jnp.max(x, axis=0, keepdims=True)                       # (1, TB)
    sh = x - m                                                  # (C, TB)
    lse = jnp.log(jnp.sum(jnp.exp(sh), axis=0, keepdims=True))  # (1, TB)
    sum_sh = jnp.sum(sh, axis=0, keepdims=True)                 # (1, TB)

    # shifted logit at the label index via iota mask (pure VPU, no gather).
    row_ids = jax.lax.broadcasted_iota(jnp.int32, x.shape, 0)
    sh_lab = jnp.sum(jnp.where(row_ids == labels, sh, 0.0), axis=0, keepdims=True)

    # sum_c logp = sum_sh - C*lse ;  logp[label] = sh_lab - lse
    # loss_row   = ENT - base*sum_c logp - (conf-base)*logp[label]
    loss_col = (jnp.float32(ent_const)
                - jnp.float32(base) * (sum_sh - classes * lse)
                - jnp.float32(conf_minus_base) * (sh_lab - lse))  # (1, TB)

    if masked:  # static branch: zero out padded batch columns
        col = pl.program_id(0) * tb + jax.lax.broadcasted_iota(jnp.int32, (1, tb), 1)
        loss_col = jnp.where(col < b_real, loss_col, 0.0)

    out_ref[...] = loss_col


def label_smoothing_loss(pred, label, *, smoothing=SMOOTHING, classes=CLASSES,
                         block_b=1024):
    B, C = pred.shape
    assert C == classes, f"pred must have {classes} classes, got {C}"
    assert block_b % 128 == 0

    conf = 1.0 - smoothing
    base = smoothing / classes
    ent_const = conf * math.log(conf) + (classes - 1) * (
        base * math.log(base) if base > 0.0 else 0.0)

    # Lane-dense layout (layout plumbing only): classes on sublanes, batch on lanes.
    pred_t = jnp.asarray(pred).T                                # (C, B)
    labels = jnp.asarray(label).astype(jnp.int32).reshape(1, B)  # (1, B)

    if B <= block_b:
        tb, b_pad = B, B                      # single full-width block, no padding
    else:
        tb = block_b                          # multiple of 128 -> lane-aligned blocks
        b_pad = pl.cdiv(B, tb) * tb
    if b_pad != B:
        pred_t = jnp.pad(pred_t, ((0, 0), (0, b_pad - B)))
        labels = jnp.pad(labels, ((0, 0), (0, b_pad - B)))
    nb = b_pad // tb
    masked = b_pad != B

    kernel = partial(_label_smoothing_kernel, classes=classes, base=base,
                     conf_minus_base=conf - base, ent_const=ent_const,
                     tb=tb, b_real=B, masked=masked)

    # Deeper input pipelining only pays off when the grid is long enough.
    if nb >= 3:
        pred_spec = pl.BlockSpec((C, tb), lambda i: (0, i),
                                 pipeline_mode=pl.Buffered(3))
    else:
        pred_spec = pl.BlockSpec((C, tb), lambda i: (0, i))

    per_row = pl.pallas_call(
        kernel,
        grid=(nb,),
        in_specs=[
            pred_spec,                                   # pred_t  (C, B_pad)
            pl.BlockSpec((1, tb), lambda i: (0, i)),     # labels  (1, B_pad)
        ],
        out_specs=pl.BlockSpec((1, tb), lambda i: (0, i)),
        out_shape=jax.ShapeDtypeStruct((1, b_pad), jnp.float32),
        compiler_params=pltpu.CompilerParams(
            dimension_semantics=("parallel",),
            vmem_limit_bytes=32 * 1024 * 1024,
        ),
    )(pred_t, labels)

    # Tiny final reduction + batchmean division kept in the wrapper.
    return jnp.sum(per_row) / jnp.float32(B)


def _reference(pred, label, smoothing=SMOOTHING, classes=CLASSES):
    # Pure-JAX reference mirroring the PyTorch module.
    logp = jax.nn.log_softmax(pred.astype(jnp.float32), axis=1)
    B, C = pred.shape
    base = jnp.full((B, C), smoothing / classes, dtype=jnp.float32)
    onehot = jax.nn.one_hot(label, C, dtype=jnp.float32)
    target = jnp.where(onehot > 0, 1.0 - smoothing, base)
    return jnp.sum(target * (jnp.log(target) - logp)) / B


if __name__ == "__main__":
    key = jax.random.PRNGKey(0)
    k1, k2, k3, k4 = jax.random.split(key, 4)

    # Small shape consistent with the module: pred [B, 43], label [B].
    B = 8
    pred = jax.random.normal(k1, (B, CLASSES), dtype=jnp.float32)
    label = jax.random.randint(k2, (B,), 0, CLASSES, dtype=jnp.int32)

    loss = jax.block_until_ready(label_smoothing_loss(pred, label))
    ref = _reference(pred, label)
    assert jnp.allclose(loss, ref, rtol=1e-5, atol=1e-5), (loss, ref)

    # Exercise the tiled path: multi-block grid, padding mask, Buffered(3) pipeline.
    B2 = 300
    pred2 = jax.random.normal(k3, (B2, CLASSES), dtype=jnp.float32)
    label2 = jax.random.randint(k4, (B2,), 0, CLASSES, dtype=jnp.int32)
    loss2 = jax.block_until_ready(label_smoothing_loss(pred2, label2, block_b=128))
    ref2 = _reference(pred2, label2)
    assert jnp.allclose(loss2, ref2, rtol=1e-4, atol=1e-4), (loss2, ref2)

    print("KERNEL_OK")
</pallas_src>

<mosaic_0001>
module attributes {stable_mosaic.version = 11 : i64} {
  func.func @_label_smoothing_kernel(%arg0: i32, %arg1: memref<43x8xf32, #tpu.memory_space<vmem>>, %arg2: memref<1x8xi32, #tpu.memory_space<vmem>>, %arg3: memref<1x8xf32, #tpu.memory_space<vmem>>) attributes {dimension_semantics = [#tpu.dimension_semantics<parallel>], iteration_bounds = array<i64: 1>, scalar_prefetch = 0 : i64, scratch_operands = 0 : i64, tpu.core_type = #tpu.core_type<tc>, window_params = [{transform_indices = @transform_0, window_bounds = array<i64: 43, 8>}, {transform_indices = @transform_1, window_bounds = array<i64: 1, 8>}, {transform_indices = @transform_2, window_bounds = array<i64: 1, 8>}]} {
    %c0 = arith.constant 0 : index
    %c0_0 = arith.constant 0 : index
    %0 = vector.load %arg1[%c0, %c0_0] : memref<43x8xf32, #tpu.memory_space<vmem>>, vector<43x8xf32>
    %c0_1 = arith.constant 0 : index
    %c0_2 = arith.constant 0 : index
    %1 = vector.load %arg2[%c0_1, %c0_2] : memref<1x8xi32, #tpu.memory_space<vmem>>, vector<1x8xi32>
    %cst = arith.constant dense<0xFF800000> : vector<8xf32>
    %2 = vector.multi_reduction <maximumf>, %0, %cst [0] : vector<43x8xf32> to vector<8xf32>
    %3 = vector.shape_cast %2 : vector<8xf32> to vector<1x8xf32>
    %4 = vector.broadcast %3 : vector<1x8xf32> to vector<43x8xf32>
    %5 = arith.subf %0, %4 : vector<43x8xf32>
    %6 = math.exp %5 : vector<43x8xf32>
    %cst_3 = arith.constant dense<0.000000e+00> : vector<8xf32>
    %7 = vector.multi_reduction <add>, %6, %cst_3 [0] : vector<43x8xf32> to vector<8xf32>
    %8 = vector.shape_cast %7 : vector<8xf32> to vector<1x8xf32>
    %9 = math.log %8 : vector<1x8xf32>
    %cst_4 = arith.constant dense<0.000000e+00> : vector<8xf32>
    %10 = vector.multi_reduction <add>, %5, %cst_4 [0] : vector<43x8xf32> to vector<8xf32>
    %11 = vector.shape_cast %10 : vector<8xf32> to vector<1x8xf32>
    %12 = tpu.iota {dimensions = array<i32: 0>} : vector<43x8xi32>
    %13 = vector.broadcast %1 : vector<1x8xi32> to vector<43x8xi32>
    %14 = arith.cmpi eq, %12, %13 : vector<43x8xi32>
    %cst_5 = arith.constant 0.000000e+00 : f32
    %15 = vector.broadcast %cst_5 : f32 to vector<43x8xf32>
    %16 = arith.select %14, %5, %15 : vector<43x8xi1>, vector<43x8xf32>
    %cst_6 = arith.constant dense<0.000000e+00> : vector<8xf32>
    %17 = vector.multi_reduction <add>, %16, %cst_6 [0] : vector<43x8xf32> to vector<8xf32>
    %18 = vector.shape_cast %17 : vector<8xf32> to vector<1x8xf32>
    %cst_7 = arith.constant 4.300000e+01 : f32
    %19 = vector.broadcast %cst_7 : f32 to vector<1x8xf32>
    %20 = arith.mulf %19, %9 : vector<1x8xf32>
    %21 = arith.subf %11, %20 : vector<1x8xf32>
    %cst_8 = arith.constant 2.32558144E-4 : f32
    %22 = vector.broadcast %cst_8 : f32 to vector<1x8xf32>
    %23 = arith.mulf %22, %21 : vector<1x8xf32>
    %cst_9 = arith.constant -0.0916678681 : f32
    %24 = vector.broadcast %cst_9 : f32 to vector<1x8xf32>
    %25 = arith.subf %24, %23 : vector<1x8xf32>
    %26 = arith.subf %18, %9 : vector<1x8xf32>
    %cst_10 = arith.constant 0.989767432 : f32
    %27 = vector.broadcast %cst_10 : f32 to vector<1x8xf32>
    %28 = arith.mulf %27, %26 : vector<1x8xf32>
    %29 = arith.subf %25, %28 : vector<1x8xf32>
    %c0_11 = arith.constant 0 : index
    %c0_12 = arith.constant 0 : index
    %30 = vector.load %arg3[%c0_11, %c0_12] : memref<1x8xf32, #tpu.memory_space<vmem>>, vector<1x8xf32>
    tpu.vector_store %arg3[%c0_11, %c0_12], %29 {strides = array<i32>} : memref<1x8xf32, #tpu.memory_space<vmem>>, vector<1x8xf32>,
    return
  }
  func.func @transform_0(%arg0: i32) -> (i32, i32) {
    %c0_i32 = arith.constant 0 : i32
    %c0_i32_0 = arith.constant 0 : i32
    return %c0_i32, %arg0 : i32, i32
  }
  func.func @transform_1(%arg0: i32) -> (i32, i32) {
    %c0_i32 = arith.constant 0 : i32
    %c0_i32_0 = arith.constant 0 : i32
    return %c0_i32, %arg0 : i32, i32
  }
  func.func @transform_2(%arg0: i32) -> (i32, i32) {
    %c0_i32 = arith.constant 0 : i32
    %c0_i32_0 = arith.constant 0 : i32
    return %c0_i32, %arg0 : i32, i32
  }
}

</mosaic_0001>

<bundles_post_ra>
// kernel: tpu_custom_call.1
= control target key start
LH: loop header
LB: loop body
LE: loop exit
PB: predicated region body
PF: predicated region fallthrough
CT: control target
= control target key end

     0   :  { %7 = vsyncpa [#allocation3], 0  ;;  %vm19_vm0 = vcmask 64512   ;;  %vm26_vm1 = vcmask 59392   ;;  %v92_v19 = vlaneseq  ;;  %vm136_vm8 = vcmask 57344   ;;  %s265_s0 = inlined_call_operand.vmem [shape: f32[43,8], index: 0, kind: input, shape index: {}]   ;;  %s266_s1 = inlined_call_operand.vmem [shape: s32[1,8], index: 1, kind: input, shape index: {}]   ;;  %s267_s2 = inlined_call_operand.hbm [shape: f32[1,8], index: 2, kind: output, shape index: {}]  }
   0x1   :  { %v12_v0 = vld [vmem:[%s265_s0] sm:$0xff]  ;;  %v13_v1 = vld [vmem:[%s265_s0 + $0x8] sm:$0xff]  ;;  %v14_v2 = vld [vmem:[%s265_s0 + $0x10] sm:$0xff]  ;;  %s145_s25 = sshll.u32 %s267_s2, 4  ;;  %s146_s25 = int_to_ptr.hbm [resolvable:$true] %s145_s25 }
   0x2   :  { %v15_v3 = vld [vmem:[%s265_s0 + $0x18] sm:$0xff]  ;;  %v16_v4 = vld [vmem:[%s265_s0 + $0x20] sm:$0xff]  ;;  %v20_v5 = vsel %vm19_vm0, %v12_v0, -inf  ;;  %v21_v6 = vsel %vm19_vm0, %v13_v1, -inf  ;;  %v17_v7 = vld [vmem:[%s265_s0 + $0x28] sm:$0x7] }
   0x3   :  { %v22_v8 = vsel %vm19_vm0, %v14_v2, -inf  ;;  %v23_v9 = vsel %vm19_vm0, %v15_v3, -inf  ;;  %v24_v10 = vsel %vm19_vm0, %v16_v4, -inf  ;;  %v27_v11 = vsel %vm26_vm1, %v17_v7, -inf  ;;  %v155_v24 = vld [vmem:[%s266_s1] ss:$0 sm:$0xff] }
   0x4   :  { %v25_v12 = vmax.f32 %v20_v5, %v24_v10  ;;  %v28_v13 = vmax.f32 %v21_v6, %v27_v11  ;;  %v30_v14 = vmax.f32 %v22_v8, %v23_v9  ;;  %v93_v22 = vshrl.u32 %v92_v19, 7  ;;  %s196_s1 = smov [#allocation2]  }
   0x5   :  { %s143_s22 = sshll.u32 %s196_s1, 4  ;;  %s144_s22 = int_to_ptr.vmem [resolvable:$true] %s143_s22 }
   0x6   :  { %v29_v15 = vmax.f32 %v25_v12, %v28_v13  ;;  %v94_v26 = vadd.s32 8, %v93_v22  ;;  %v95_v27 = vadd.s32 16, %v93_v22  ;;  %v96_v28 = vadd.s32 24, %v93_v22 }
   0x7   :  { %v97_v35 = vadd.s32 32, %v93_v22  ;;  %vm100_vm2 = vcmp.eq.s32.totalorder %v93_v22, %v155_v24  ;;  %v98_v46 = vadd.s32 40, %v93_v22 }
   0x8   :  { %v31_v16 = vmax.f32 %v29_v15, %v30_v14  ;;  %vm101_vm3 = vcmp.eq.s32.totalorder %v94_v26, %v155_v24  ;;  %vm102_vm4 = vcmp.eq.s32.totalorder %v95_v27, %v155_v24  ;;  %vm103_vm5 = vcmp.eq.s32.totalorder %v96_v28, %v155_v24 }
   0x9   :  { %vm104_vm6 = vcmp.eq.s32.totalorder %v97_v35, %v155_v24  ;;  %vm105_vm7 = vcmp.eq.s32.totalorder %v98_v46, %v155_v24 }
   0xa   :  { %v32_v17 = vrot.slane %v31_v16, 4 }
   0xc   :  { %v33_v18 = vmax.f32 %v31_v16, %v32_v17 }
   0xe   :  { %v34_v20 = vrot.slane %v33_v18, 2 }
  0x10   :  { %v35_v21 = vmax.f32 %v33_v18, %v34_v20 }
  0x12   :  { %v36_v23 = vrot.slane %v35_v21, 1 }
  0x14   :  { %v37_v25 = vmax.f32 %v35_v21, %v36_v23 }
  0x16   :  { %v38_v29 = vsub.f32 %v12_v0, %v37_v25  ;;  %v39_v30 = vsub.f32 %v13_v1, %v37_v25  ;;  %v40_v31 = vsub.f32 %v14_v2, %v37_v25  ;;  %v41_v32 = vsub.f32 %v15_v3, %v37_v25 }
  0x17   :  { %v42_v33 = vsub.f32 %v16_v4, %v37_v25  ;;  %v43_v34 = vsub.f32 %v17_v7, %v37_v25 }
  0x18   :  { %v44_v36 = vmul.f32 1.442695, %v38_v29  ;;  %v46_v37 = vmul.f32 1.442695, %v39_v30  ;;  %v48_v38 = vmul.f32 1.442695, %v40_v31 }
  0x19   :  { %v50_v39 = vmul.f32 1.442695, %v41_v32  ;;  %v52_v40 = vmul.f32 1.442695, %v42_v33  ;;  %v75_v41 = vsel %vm19_vm0, %v38_v29, 0.0  ;;  %v76_v42 = vsel %vm19_vm0, %v39_v30, 0.0 }
  0x1a   :  { %156 = vpow2.f32 %v44_v36  ;;  %v78_v43 = vsel %vm19_vm0, %v40_v31, 0.0  ;;  %v54_v44 = vmul.f32 1.442695, %v43_v34  ;;  %v77_v45 = vadd.f32 %v76_v42, %v75_v41 }
  0x1b   :  { %158 = vpow2.f32 %v46_v37  ;;  %v106_v47 = vsel %vm100_vm2, %v38_v29, 0.0  ;;  %v107_v48 = vsel %vm101_vm3, %v39_v30, 0.0  ;;  %v80_v50 = vsel %vm19_vm0, %v41_v32, 0.0 }
  0x1c   :  { %160 = vpow2.f32 %v48_v38  ;;  %v79_v49 = vadd.f32 %v78_v43, %v77_v45  ;;  %v108_v51 = vsel %vm102_vm4, %v40_v31, 0.0  ;;  %v109_v52 = vsel %vm103_vm5, %v41_v32, 0.0 }
  0x1d   :  { %162 = vpow2.f32 %v50_v39  ;;  %v112_v53 = vsel %vm19_vm0, %v106_v47, 0.0  ;;  %v113_v54 = vsel %vm19_vm0, %v107_v48, 0.0  ;;  %v115_v55 = vsel %vm19_vm0, %v108_v51, 0.0 }
  0x1e   :  { %164 = vpow2.f32 %v52_v40  ;;  %v81_v57 = vadd.f32 %v80_v50, %v79_v49  ;;  %v110_v58 = vsel %vm104_vm6, %v42_v33, 0.0  ;;  %v114_v59 = vadd.f32 %v113_v54, %v112_v53 }
  0x1f   :  { %166 = vpow2.f32 %v54_v44  ;;  %v82_v62 = vsel %vm19_vm0, %v42_v33, 0.0  ;;  %v117_v63 = vsel %vm19_vm0, %v109_v52, 0.0  ;;  %v111_v2 = vsel %vm105_vm7, %v43_v34, 0.0 }
  0x20   :  { %v157_v56 = vpop.eup %156  ;;  %v116_v3 = vadd.f32 %v115_v55, %v114_v59  ;;  %v119_v7 = vsel %vm19_vm0, %v110_v58, 0.0  ;;  %v83_v10 = vadd.f32 %v82_v62, %v81_v57  ;;  %v84_v14 = vsel %vm26_vm1, %v43_v34, 0.0 }
  0x21   :  { %v159_v60 = vpop.eup %158  ;;  %v56_v61 = vsel %vm19_vm0, %v157_v56, 0.0  ;;  %v121_v15 = vsel %vm26_vm1, %v111_v2, 0.0 }
  0x22   :  { %v161_v0 = vpop.eup %160  ;;  %v57_v1 = vsel %vm19_vm0, %v159_v60, 0.0  ;;  %v118_v11 = vadd.f32 %v117_v63, %v116_v3  ;;  %v85_v20 = vadd.f32 %v84_v14, %v83_v10 }
  0x23   :  { %v163_v4 = vpop.eup %162  ;;  %v58_v5 = vadd.f32 %v57_v1, %v56_v61  ;;  %v59_v6 = vsel %vm19_vm0, %v161_v0, 0.0 }
  0x24   :  { %v165_v8 = vpop.eup %164  ;;  %v61_v9 = vsel %vm19_vm0, %v163_v4, 0.0  ;;  %v120_v17 = vadd.f32 %v119_v7, %v118_v11  ;;  %v86_v25 = vrot.slane %v85_v20, 4 }
  0x25   :  { %v167_v12 = vpop.eup %166  ;;  %v60_v13 = vadd.f32 %v59_v6, %v58_v5  ;;  %v63_v16 = vsel %vm19_vm0, %v165_v8, 0.0 }
  0x26   :  { %v65_v19 = vsel %vm26_vm1, %v167_v12, 0.0  ;;  %v122_v21 = vadd.f32 %v121_v15, %v120_v17  ;;  %v87_v29 = vadd.f32 %v86_v25, %v85_v20 }
  0x27   :  { %v62_v18 = vadd.f32 %v61_v9, %v60_v13 }
  0x28   :  { %v123_v23 = vrot.slane %v122_v21, 4  ;;  %v88_v33 = vrot.slane %v87_v29, 2 }
  0x29   :  { %v64_v22 = vadd.f32 %v63_v16, %v62_v18 }
  0x2a   :  { %v124_v27 = vadd.f32 %v123_v23, %v122_v21  ;;  %v89_v37 = vadd.f32 %v88_v33, %v87_v29 }
  0x2b   :  { %v66_v24 = vadd.f32 %v65_v19, %v64_v22 }
  0x2c   :  { %v125_v31 = vrot.slane %v124_v27, 2  ;;  %v90_v39 = vrot.slane %v89_v37, 1 }
  0x2d   :  { %v67_v26 = vrot.slane %v66_v24, 4 }
  0x2e   :  { %v126_v35 = vadd.f32 %v125_v31, %v124_v27  ;;  %v91_v43 = vadd.f32 %v90_v39, %v89_v37 }
  0x2f   :  { %v68_v28 = vadd.f32 %v67_v26, %v66_v24 }
  0x30   :  { %v127_v38 = vrot.slane %v126_v35, 1 }
  0x31   :  { %v69_v30 = vrot.slane %v68_v28, 2 }
  0x32   :  { %v128_v40 = vadd.f32 %v127_v38, %v126_v35 }
  0x33   :  { %v70_v32 = vadd.f32 %v69_v30, %v68_v28 }
  0x35   :  { %v71_v34 = vrot.slane %v70_v32, 1 }
  0x37   :  { %v72_v36 = vadd.f32 %v71_v34, %v70_v32 }
  0x39   :  { %168 = vlog2.f32 %v72_v36 }
  0x3f   :  { %v169_v41 = vpop.eup %168 }
  0x40   :  { %v74_v42 = vmul.f32 0.6931472, %v169_v41 }
  0x42   :  { %v129_v44 = vmul.f32 43.0, %v74_v42  ;;  %v133_v45 = vsub.f32 %v128_v40, %v74_v42 }
  0x44   :  { %v130_v46 = vsub.f32 %v91_v43, %v129_v44  ;;  %v134_v48 = vmul.f32 0.98976743, %v133_v45 }
  0x46   :  { %v131_v47 = vmul.f32 0.00023255814, %v130_v46 }
  0x48   :  { %v132_v49 = vsub.f32 -0.09166787, %v131_v47 }
  0x4a   :  { %v135_v50 = vsub.f32 %v132_v49, %v134_v48 }
  0x4c   :  { %137 = vst.msk [vmem:[#allocation2] sm:$0x1] %vm136_vm8, %v135_v50 }
  0x4d   :  { %148 = dma.vmem_to_hbm [thread:$0]  %s144_s22, 16, %s146_s25, [#allocation3]  }
  0x4e   :  { %194 = dma.done.wait [#allocation3], 16  }
  0x4f   :  { %195 = vsyncadd [#allocation3], 4294967280 }
  0x50   :  { %153 = vsyncpa [#allocation3], 1 }

</bundles_post_ra>
